<compile_context>
chip_gen: v7x
topology: tpu7x:2x2x1
jax: 0.10.0
libtpu: 0.0.40
codegen_flags: <defaults>
</compile_context>

<pallas_src>
import jax
import jax.numpy as jnp
from jax.experimental import pallas as pl
from jax.experimental.pallas import tpu as pltpu


# ----------------------------- Pallas kernel --------------------------------

def _fused_model_kernel(x_ref, a_ref,
                        ws1_ref, wn1_ref, b1_ref,
                        ws2_ref, wn2_ref, b2_ref,
                        sel_src_ref, sel_dst_ref,
                        o_ref):
    """Fused: SAGE(mean)+ReLU -> SAGE(mean)+ReLU -> u_dot_v edge scores.

    x_ref       : [N, F_in]    node features
    a_ref       : [N, N]       row-normalized adjacency (A[v,u] = mult(u->v)/deg_in(v))
    ws1/wn1     : [F_in, H]    layer-1 self / neighbor weights
    b1          : [1, H]       layer-1 bias
    ws2/wn2     : [H, H]       layer-2 self / neighbor weights
    b2          : [1, H]       layer-2 bias
    sel_src_ref : [N, Ep] f32  one-hot columns: sel_src[n, e] = (n == src[e])
    sel_dst_ref : [N, Ep] f32  one-hot columns: sel_dst[n, e] = (n == dst[e])
    o_ref       : [1, Ep] f32  edge scores (lane-dense, Ep = E padded to 128)
    """
    x = x_ref[...]
    a = a_ref[...]

    # ---- SAGEConv layer 1 ('mean') + ReLU -----------------------------------
    # self and neighbor paths are independent MXU dots; bias is a broadcast add.
    h_self = jnp.dot(x, ws1_ref[...], preferred_element_type=jnp.float32)
    neigh = jnp.dot(a, x, preferred_element_type=jnp.float32)
    h_neigh = jnp.dot(neigh, wn1_ref[...], preferred_element_type=jnp.float32)
    h = jnp.maximum(h_self + h_neigh + b1_ref[...], 0.0)

    # ---- SAGEConv layer 2 ('mean') + ReLU -----------------------------------
    h_self2 = jnp.dot(h, ws2_ref[...], preferred_element_type=jnp.float32)
    neigh2 = jnp.dot(a, h, preferred_element_type=jnp.float32)
    h_neigh2 = jnp.dot(neigh2, wn2_ref[...], preferred_element_type=jnp.float32)
    h = jnp.maximum(h_self2 + h_neigh2 + b2_ref[...], 0.0)

    # ---- DotProductPredictor: score[e] = h[src[e]] . h[dst[e]] ---------------
    # Two independent matmuls contracting over the node axis:
    #   g_src[f, e] = sum_n h[n, f] * sel_src[n, e]  == h[src[e], f]
    # then elementwise multiply + sublane reduce -> lane-dense (1, Ep).
    g_src = jax.lax.dot_general(h, sel_src_ref[...], (((0,), (0,)), ((), ())),
                                preferred_element_type=jnp.float32)   # [H, Ep]
    g_dst = jax.lax.dot_general(h, sel_dst_ref[...], (((0,), (0,)), ((), ())),
                                preferred_element_type=jnp.float32)   # [H, Ep]
    o_ref[...] = jnp.sum(g_src * g_dst, axis=0, keepdims=True)        # [1, Ep]


# ------------------------------ Wrapper --------------------------------------

_VMEM = pl.BlockSpec(memory_space=pltpu.MemorySpace.VMEM)


def build_edge_onehots(src, dst, n_nodes, pad_to=128):
    """One-hot [N, Ep] selection matrices (built once per static graph).

    Padded edge columns are all-zero, so their (discarded) scores are 0.
    """
    e = src.shape[0]
    ep = ((e + pad_to - 1) // pad_to) * pad_to
    sel_src = jnp.zeros((n_nodes, ep), jnp.float32).at[src, jnp.arange(e)].set(1.0)
    sel_dst = jnp.zeros((n_nodes, ep), jnp.float32).at[dst, jnp.arange(e)].set(1.0)
    return sel_src, sel_dst


def model_forward(x, a_mean, sel_src, sel_dst, n_edges, params):
    n, f_in = x.shape
    h = params["ws1"].shape[1]
    ep = sel_src.shape[1]

    # Advisory cost estimate for XLA scheduling around the custom call.
    flops = 2 * (n * f_in * h * 2 + n * n * f_in        # layer 1
                 + n * h * h * 2 + n * n * h            # layer 2
                 + 2 * n * h * ep)                      # edge gathers
    bytes_accessed = 4 * (x.size + a_mean.size + sel_src.size + sel_dst.size
                          + sum(p.size for p in params.values()) + ep)

    scores = pl.pallas_call(
        _fused_model_kernel,
        out_shape=jax.ShapeDtypeStruct((1, ep), jnp.float32),  # lane-dense scores
        in_specs=[_VMEM] * 10,
        out_specs=_VMEM,
        cost_estimate=pl.CostEstimate(flops=flops, transcendentals=0,
                                      bytes_accessed=bytes_accessed),
    )(x, a_mean,
      params["ws1"], params["wn1"], params["b1"],
      params["ws2"], params["wn2"], params["b2"],
      sel_src, sel_dst)

    # Match DGL edata['score'] shape [E, 1].
    return scores[:, :n_edges].reshape(n_edges, 1)


# ------------------------------ Reference -----------------------------------

def model_forward_ref(x, a_mean, src, dst, params):
    h = jnp.maximum(x @ params["ws1"] + (a_mean @ x) @ params["wn1"] + params["b1"], 0.0)
    h = jnp.maximum(h @ params["ws2"] + (a_mean @ h) @ params["wn2"] + params["b2"], 0.0)
    return jnp.sum(h[src] * h[dst], axis=-1, keepdims=True)


# -------------------------------- Main ---------------------------------------

if __name__ == "__main__":
    key = jax.random.PRNGKey(0)
    N, E = 16, 48               # nodes, edges
    in_features, hidden_features = 8, 32

    k_src, k_dst, k_x, k1, k2, k3, k4 = jax.random.split(key, 7)

    # Synthetic graph (edge list u -> v).
    src = jax.random.randint(k_src, (E,), 0, N)
    dst = jax.random.randint(k_dst, (E,), 0, N)

    # Row-normalized adjacency for DGL-style mean aggregation over in-edges;
    # zero in-degree nodes get a zero neighbor feature (matches DGL).
    adj = jnp.zeros((N, N), jnp.float32).at[dst, src].add(1.0)
    deg = adj.sum(axis=1)
    a_mean = adj / jnp.maximum(deg, 1.0)[:, None]

    # Node features.
    x = jax.random.normal(k_x, (N, in_features), jnp.float32)

    # Deterministic parameters (synthetic init; stored as [F_in, F_out]).
    scale1 = 1.0 / jnp.sqrt(in_features)
    scale2 = 1.0 / jnp.sqrt(hidden_features)
    params = {
        "ws1": scale1 * jax.random.normal(k1, (in_features, hidden_features), jnp.float32),
        "wn1": scale1 * jax.random.normal(k2, (in_features, hidden_features), jnp.float32),
        "b1": jnp.zeros((1, hidden_features), jnp.float32),
        "ws2": scale2 * jax.random.normal(k3, (hidden_features, hidden_features), jnp.float32),
        "wn2": scale2 * jax.random.normal(k4, (hidden_features, hidden_features), jnp.float32),
        "b2": jnp.zeros((1, hidden_features), jnp.float32),
    }
    # TODO(synk): conv3 (hidden -> out_features) is defined in __init__ but unused
    # in the reference forward, so it is intentionally not instantiated here.

    # Static-graph precompute (outside the hot path): lane-dense one-hot gathers.
    assert bool(jnp.all((src >= 0) & (src < N))) and bool(jnp.all((dst >= 0) & (dst < N)))
    sel_src, sel_dst = build_edge_onehots(src, dst, N, pad_to=128)

    scores = jax.block_until_ready(model_forward(x, a_mean, sel_src, sel_dst, E, params))
    ref = model_forward_ref(x, a_mean, src, dst, params)

    assert scores.shape == (E, 1)
    assert jnp.allclose(scores, ref, atol=1e-4, rtol=1e-4)
    print("KERNEL_OK")
</pallas_src>

<mosaic_0001>
module attributes {stable_mosaic.version = 11 : i64} {
  func.func @_fused_model_kernel(%arg0: memref<16x8xf32, #tpu.memory_space<vmem>>, %arg1: memref<16x16xf32, #tpu.memory_space<vmem>>, %arg2: memref<8x32xf32, #tpu.memory_space<vmem>>, %arg3: memref<8x32xf32, #tpu.memory_space<vmem>>, %arg4: memref<1x32xf32, #tpu.memory_space<vmem>>, %arg5: memref<32x32xf32, #tpu.memory_space<vmem>>, %arg6: memref<32x32xf32, #tpu.memory_space<vmem>>, %arg7: memref<1x32xf32, #tpu.memory_space<vmem>>, %arg8: memref<16x128xf32, #tpu.memory_space<vmem>>, %arg9: memref<16x128xf32, #tpu.memory_space<vmem>>, %arg10: memref<1x128xf32, #tpu.memory_space<vmem>>) attributes {dimension_semantics = [], scalar_prefetch = 0 : i64, scratch_operands = 0 : i64, tpu.core_type = #tpu.core_type<tc>} {
    %c0 = arith.constant 0 : index
    %c0_0 = arith.constant 0 : index
    %0 = vector.load %arg0[%c0, %c0_0] : memref<16x8xf32, #tpu.memory_space<vmem>>, vector<16x8xf32>
    %c0_1 = arith.constant 0 : index
    %c0_2 = arith.constant 0 : index
    %1 = vector.load %arg1[%c0_1, %c0_2] : memref<16x16xf32, #tpu.memory_space<vmem>>, vector<16x16xf32>
    %c0_3 = arith.constant 0 : index
    %c0_4 = arith.constant 0 : index
    %2 = vector.load %arg2[%c0_3, %c0_4] : memref<8x32xf32, #tpu.memory_space<vmem>>, vector<8x32xf32>
    %cst = arith.constant dense<0.000000e+00> : vector<16x32xf32>
    %3 = tpu.matmul %0, %2, %cst {dimension_numbers = #tpu.dot_dimension_numbers<[1], [0], [0], [1], [0, 0, 1, 1], [], []>} : vector<16x8xf32>, vector<8x32xf32>, vector<16x32xf32> -> vector<16x32xf32>
    %cst_5 = arith.constant dense<0.000000e+00> : vector<16x8xf32>
    %4 = tpu.matmul %1, %0, %cst_5 {dimension_numbers = #tpu.dot_dimension_numbers<[1], [0], [0], [1], [0, 0, 1, 1], [], []>} : vector<16x16xf32>, vector<16x8xf32>, vector<16x8xf32> -> vector<16x8xf32>
    %c0_6 = arith.constant 0 : index
    %c0_7 = arith.constant 0 : index
    %5 = vector.load %arg3[%c0_6, %c0_7] : memref<8x32xf32, #tpu.memory_space<vmem>>, vector<8x32xf32>
    %cst_8 = arith.constant dense<0.000000e+00> : vector<16x32xf32>
    %6 = tpu.matmul %4, %5, %cst_8 {dimension_numbers = #tpu.dot_dimension_numbers<[1], [0], [0], [1], [0, 0, 1, 1], [], []>} : vector<16x8xf32>, vector<8x32xf32>, vector<16x32xf32> -> vector<16x32xf32>
    %7 = arith.addf %3, %6 : vector<16x32xf32>
    %c0_9 = arith.constant 0 : index
    %c0_10 = arith.constant 0 : index
    %8 = vector.load %arg4[%c0_9, %c0_10] : memref<1x32xf32, #tpu.memory_space<vmem>>, vector<1x32xf32>
    %9 = vector.broadcast %8 : vector<1x32xf32> to vector<16x32xf32>
    %10 = arith.addf %7, %9 : vector<16x32xf32>
    %cst_11 = arith.constant 0.000000e+00 : f32
    %11 = vector.broadcast %cst_11 : f32 to vector<16x32xf32>
    %12 = arith.maximumf %10, %11 : vector<16x32xf32>
    %c0_12 = arith.constant 0 : index
    %c0_13 = arith.constant 0 : index
    %13 = vector.load %arg5[%c0_12, %c0_13] : memref<32x32xf32, #tpu.memory_space<vmem>>, vector<32x32xf32>
    %cst_14 = arith.constant dense<0.000000e+00> : vector<16x32xf32>
    %14 = tpu.matmul %12, %13, %cst_14 {dimension_numbers = #tpu.dot_dimension_numbers<[1], [0], [0], [1], [0, 0, 1, 1], [], []>} : vector<16x32xf32>, vector<32x32xf32>, vector<16x32xf32> -> vector<16x32xf32>
    %cst_15 = arith.constant dense<0.000000e+00> : vector<16x32xf32>
    %15 = tpu.matmul %1, %12, %cst_15 {dimension_numbers = #tpu.dot_dimension_numbers<[1], [0], [0], [1], [0, 0, 1, 1], [], []>} : vector<16x16xf32>, vector<16x32xf32>, vector<16x32xf32> -> vector<16x32xf32>
    %c0_16 = arith.constant 0 : index
    %c0_17 = arith.constant 0 : index
    %16 = vector.load %arg6[%c0_16, %c0_17] : memref<32x32xf32, #tpu.memory_space<vmem>>, vector<32x32xf32>
    %cst_18 = arith.constant dense<0.000000e+00> : vector<16x32xf32>
    %17 = tpu.matmul %15, %16, %cst_18 {dimension_numbers = #tpu.dot_dimension_numbers<[1], [0], [0], [1], [0, 0, 1, 1], [], []>} : vector<16x32xf32>, vector<32x32xf32>, vector<16x32xf32> -> vector<16x32xf32>
    %18 = arith.addf %14, %17 : vector<16x32xf32>
    %c0_19 = arith.constant 0 : index
    %c0_20 = arith.constant 0 : index
    %19 = vector.load %arg7[%c0_19, %c0_20] : memref<1x32xf32, #tpu.memory_space<vmem>>, vector<1x32xf32>
    %20 = vector.broadcast %19 : vector<1x32xf32> to vector<16x32xf32>
    %21 = arith.addf %18, %20 : vector<16x32xf32>
    %cst_21 = arith.constant 0.000000e+00 : f32
    %22 = vector.broadcast %cst_21 : f32 to vector<16x32xf32>
    %23 = arith.maximumf %21, %22 : vector<16x32xf32>
    %c0_22 = arith.constant 0 : index
    %c0_23 = arith.constant 0 : index
    %24 = vector.load %arg8[%c0_22, %c0_23] : memref<16x128xf32, #tpu.memory_space<vmem>>, vector<16x128xf32>
    %cst_24 = arith.constant dense<0.000000e+00> : vector<32x128xf32>
    %25 = tpu.matmul %23, %24, %cst_24 {dimension_numbers = #tpu.dot_dimension_numbers<[0], [0], [1], [1], [0, 1, 1, 1], [], []>} : vector<16x32xf32>, vector<16x128xf32>, vector<32x128xf32> -> vector<32x128xf32>
    %c0_25 = arith.constant 0 : index
    %c0_26 = arith.constant 0 : index
    %26 = vector.load %arg9[%c0_25, %c0_26] : memref<16x128xf32, #tpu.memory_space<vmem>>, vector<16x128xf32>
    %cst_27 = arith.constant dense<0.000000e+00> : vector<32x128xf32>
    %27 = tpu.matmul %23, %26, %cst_27 {dimension_numbers = #tpu.dot_dimension_numbers<[0], [0], [1], [1], [0, 1, 1, 1], [], []>} : vector<16x32xf32>, vector<16x128xf32>, vector<32x128xf32> -> vector<32x128xf32>
    %28 = arith.mulf %25, %27 : vector<32x128xf32>
    %cst_28 = arith.constant dense<0.000000e+00> : vector<128xf32>
    %29 = vector.multi_reduction <add>, %28, %cst_28 [0] : vector<32x128xf32> to vector<128xf32>
    %30 = vector.shape_cast %29 : vector<128xf32> to vector<1x128xf32>
    %c0_29 = arith.constant 0 : index
    %c0_30 = arith.constant 0 : index
    %31 = vector.load %arg10[%c0_29, %c0_30] : memref<1x128xf32, #tpu.memory_space<vmem>>, vector<1x128xf32>
    tpu.vector_store %arg10[%c0_29, %c0_30], %30 {strides = array<i32>} : memref<1x128xf32, #tpu.memory_space<vmem>>, vector<1x128xf32>,
    return
  }
}

</mosaic_0001>

<bundles_post_ra>
// kernel: tpu_custom_call.1
= control target key start
LH: loop header
LB: loop body
LE: loop exit
PB: predicated region body
PF: predicated region fallthrough
CT: control target
= control target key end

     0   :  { %15 = vsyncpa [#allocation3], 0  ;;  %s1365_s0 = inlined_call_operand.vmem [shape: f32[16,8], index: 0, kind: input, shape index: {}]   ;;  %s1366_s1 = inlined_call_operand.hbm [shape: f32[16,16], index: 1, kind: input, shape index: {}]   ;;  %s1367_s2 = inlined_call_operand.hbm [shape: f32[8,32], index: 2, kind: input, shape index: {}]   ;;  %s1368_s3 = inlined_call_operand.hbm [shape: f32[8,32], index: 3, kind: input, shape index: {}]   ;;  %s1369_s4 = inlined_call_operand.vmem [shape: f32[1,32], index: 4, kind: input, shape index: {}]   ;;  %s1370_s5 = inlined_call_operand.vmem [shape: f32[32,32], index: 5, kind: input, shape index: {}]   ;;  %s1371_s6 = inlined_call_operand.hbm [shape: f32[32,32], index: 6, kind: input, shape index: {}]   ;;  %s1372_s7 = inlined_call_operand.vmem [shape: f32[1,32], index: 7, kind: input, shape index: {}]   ;;  %s1373_s8 = inlined_call_operand.vmem [shape: f32[16,128], index: 8, kind: input, shape index: {}]   ;;  %s1374_s9 = inlined_call_operand.hbm [shape: f32[16,128], index: 9, kind: input, shape index: {}]   ;;  %s1375_s10 = inlined_call_operand.hbm [shape: f32[1,128], index: 10, kind: output, shape index: {}]  }
   0x1   :  { %16 = vsyncpa [#allocation6], 0 }
   0x2   :  { %17 = vsyncpa [#allocation9], 0 }
   0x3   :  { %18 = vsyncpa [#allocation4], 0  ;;  %s1179_s13 = smov [#allocation5]   ;;  %s1039_s17 = scalar_lea.hbm %s1367_s2, 128 }
   0x4   :  { %s39_s14 = sshll.u32 %s1179_s13, 4  ;;  %p1040_p0 = scmp.ne.s32.totalorder %s1367_s2, %s1039_s17  ;;  %s40_s14 = int_to_ptr.vmem [resolvable:$true] %s39_s14 }
   0x5   :  { %p1043_p1 = scmp.lt.u32.totalorder %s1039_s17, %s1367_s2 }
   0x7   :  { %p1045_p2 = pnand %p1043_p1, %p1040_p0 }
   0x9   :  { %1048 = shalt.err (!%p1045_p2)
}
   0xa   :  { %s1049_s22 = scalar_lea.vmem %s40_s14, 128  ;;  %p1054_p4 = scmp.lt.s32.totalorder %s40_s14, %s40_s14 }
   0xb   :  { %p1050_p3 = scmp.ne.s32.totalorder %s40_s14, %s1049_s22  ;;  %p1055_p5 = scmp.lt.s32.totalorder %s1049_s22, %s1049_s22 }
   0xd   :  { %p1056_p6 = por %p1055_p5, %p1054_p4 }
   0xf   :  { %p1057_p7 = pnand %p1056_p6, %p1050_p3 }
  0x11   :  { %1060 = shalt.err (!%p1057_p7)
}
  0x12   :  { %42 = dma.hbm_to_vmem [thread:$0]  %s1367_s2, 128, %s40_s14, [#allocation6]  }
  0x13   :  { %s1180_s25 = smov [#allocation8]   ;;  %s1181_s27 = smov [#allocation2]  }
  0x14   :  { %s62_s26 = sshll.u32 %s1180_s25, 4  ;;  %s26_s28 = sshll.u32 %s1181_s27, 4  ;;  %s63_s26 = int_to_ptr.vmem [resolvable:$true] %s62_s26  ;;  %s27_s28 = int_to_ptr.vmem [resolvable:$true] %s26_s28 }
  0x15   :  { %s1061_s11 = scalar_lea.hbm %s1371_s6, 512 }
  0x16   :  { %p1062_p8 = scmp.ne.s32.totalorder %s1371_s6, %s1061_s11  ;;  %p1065_p9 = scmp.lt.u32.totalorder %s1061_s11, %s1371_s6 }
  0x18   :  { %p1067_p10 = pnand %p1065_p9, %p1062_p8 }
  0x1a   :  { %1070 = shalt.err (!%p1067_p10)
}
  0x1b   :  { %s1071_s2 = scalar_lea.vmem %s63_s26, 512  ;;  %p1076_p12 = scmp.lt.s32.totalorder %s63_s26, %s63_s26 }
  0x1c   :  { %p1072_p11 = scmp.ne.s32.totalorder %s63_s26, %s1071_s2  ;;  %p1077_p13 = scmp.lt.s32.totalorder %s1071_s2, %s1071_s2 }
  0x1e   :  { %p1078_p0 = por %p1077_p13, %p1076_p12 }
  0x20   :  { %p1079_p1 = pnand %p1078_p0, %p1072_p11 }
  0x22   :  { %1082 = shalt.err (!%p1079_p1)
}
  0x23   :  { %s1182_s14 = smov 128   ;;  %s1183_s17 = smov 8  }
  0x24   :  { %68 = dma.hbm_to_vmem [thread:$0]  %s1371_s6, 512, %s63_s26, [#allocation9], %s1182_s14, %s1182_s14, %s1183_s17  }
  0x25   :  { %s1083_s22 = scalar_lea.hbm %s1366_s1, 256 }
  0x26   :  { %p1084_p2 = scmp.ne.s32.totalorder %s1366_s1, %s1083_s22  ;;  %p1087_p3 = scmp.lt.u32.totalorder %s1083_s22, %s1366_s1 }
  0x28   :  { %p1089_p4 = pnand %p1087_p3, %p1084_p2 }
  0x2a   :  { %1092 = shalt.err (!%p1089_p4)
}
  0x2b   :  { %s1093_s29 = scalar_lea.vmem %s27_s28, 256  ;;  %p1098_p6 = scmp.lt.s32.totalorder %s27_s28, %s27_s28 }
  0x2c   :  { %p1094_p5 = scmp.ne.s32.totalorder %s27_s28, %s1093_s29  ;;  %p1099_p7 = scmp.lt.s32.totalorder %s1093_s29, %s1093_s29 }
  0x2e   :  { %p1100_p8 = por %p1099_p7, %p1098_p6 }
  0x30   :  { %p1101_p9 = pnand %p1100_p8, %p1094_p5 }
  0x32   :  { %1104 = shalt.err (!%p1101_p9)
}
  0x33   :  { %32 = dma.hbm_to_vmem [thread:$0]  %s1366_s1, 256, %s27_s28, [#allocation3], %s1182_s14, %s1182_s14, %s1183_s17  }
  0x34   :  { %s1184_s30 = smov [#allocation7]   ;;  %s1185_s12 = smov [#allocation10]  }
  0x35   :  { %s49_s11 = sshll.u32 %s1184_s30, 4  ;;  %s78_s13 = sshll.u32 %s1185_s12, 4  ;;  %s50_s11 = int_to_ptr.vmem [resolvable:$true] %s49_s11  ;;  %s79_s13 = int_to_ptr.vmem [resolvable:$true] %s78_s13 }
  0x36   :  { %s1105_s2 = scalar_lea.hbm %s1368_s3, 128 }
  0x37   :  { %p1106_p10 = scmp.ne.s32.totalorder %s1368_s3, %s1105_s2  ;;  %p1109_p11 = scmp.lt.u32.totalorder %s1105_s2, %s1368_s3 }
  0x39   :  { %p1111_p12 = pnand %p1109_p11, %p1106_p10 }
  0x3b   :  { %1114 = shalt.err (!%p1111_p12)
}
  0x3c   :  { %s1115_s1 = scalar_lea.vmem %s50_s11, 128  ;;  %p1120_p0 = scmp.lt.s32.totalorder %s50_s11, %s50_s11 }
  0x3d   :  { %p1116_p13 = scmp.ne.s32.totalorder %s50_s11, %s1115_s1  ;;  %p1121_p1 = scmp.lt.s32.totalorder %s1115_s1, %s1115_s1 }
  0x3f   :  { %p1122_p2 = por %p1121_p1, %p1120_p0 }
  0x41   :  { %p1123_p3 = pnand %p1122_p2, %p1116_p13 }
  0x43   :  { %1126 = shalt.err (!%p1123_p3)
}
  0x44   :  { %52 = dma.hbm_to_vmem [thread:$0]  %s1368_s3, 128, %s50_s11, [#allocation6]  }
  0x45   :  { %s1127_s25 = scalar_lea.hbm %s1374_s9, 256 }
  0x46   :  { %p1128_p4 = scmp.ne.s32.totalorder %s1374_s9, %s1127_s25  ;;  %p1131_p5 = scmp.lt.u32.totalorder %s1127_s25, %s1374_s9 }
  0x48   :  { %p1133_p6 = pnand %p1131_p5, %p1128_p4 }
  0x4a   :  { %1136 = shalt.err (!%p1133_p6)
}
  0x4b   :  { %s1137_s30 = scalar_lea.vmem %s79_s13, 256  ;;  %p1142_p8 = scmp.lt.s32.totalorder %s79_s13, %s79_s13 }
  0x4c   :  { %p1138_p7 = scmp.ne.s32.totalorder %s79_s13, %s1137_s30  ;;  %p1143_p9 = scmp.lt.s32.totalorder %s1137_s30, %s1137_s30 }
  0x4e   :  { %p1144_p10 = por %p1143_p9, %p1142_p8 }
  0x50   :  { %p1145_p11 = pnand %p1144_p10, %p1138_p7 }
  0x52   :  { %1148 = shalt.err (!%p1145_p11)
}
  0x53   :  { %84 = dma.hbm_to_vmem [thread:$0]  %s1374_s9, 256, %s79_s13, [#allocation9], %s1182_s14, %s1182_s14, %s1183_s17  }
  0x54   :  { %1171 = dma.done.wait [#allocation3], 256  }
  0x55   :  { %1172 = vsyncadd [#allocation3], 4294967040 }
  0x56   :  { %1173 = dma.done.wait [#allocation6], 256  }
  0x57   :  { %1174 = vsyncadd [#allocation6], 4294967040 }
  0x58   :  { %1175 = dma.done.wait [#allocation9], 768  }
  0x59   :  { %1176 = vsyncadd [#allocation9], 4294966528  ;;  %vm105_vm0 = vcmask 130048   ;;  %v100_v0 = vld [vmem:[%s1365_s0] sm:$0xff]  ;;  %v101_v1 = vld [vmem:[%s1365_s0 + $0x8] sm:$0xff]  ;;  %vm188_vm1 = vcmask 64512  }
  0x5a   :  { %v102_v2 = vld [vmem:[#allocation2] sm:$0xff]  ;;  %v994_v3 = vpack.c.bf16 %v101_v1, %v100_v0  ;;  %v103_v4 = vld [vmem:[#allocation2 + $0x8] sm:$0xff]  ;;  %v187_v5 = vld [vmem:[#allocation7] sm:$0xff]  ;;  %vm445_vm2 = vcmask 261120  }
  0x5b   :  { %932 = vmatprep.mubr.msk.f32.mxu0 %vm105_vm0, %v102_v2  ;;  %935 = vmatprep.subr.mxu1 %v187_v5  ;;  %v104_v6 = vld [vmem:[#allocation5] sm:$0xff]  ;;  %v441_v9 = vld [vmem:[#allocation8] sm:$0xff]  ;;  %v442_v10 = vld [vmem:[#allocation8 + $0x8] sm:$0xff] }
  0x5c   :  { %995 = vmatprep.subr.bf16.mxu0 %v994_v3  ;;  %936 = vmatpush3.msra.mxu1 %v187_v5  ;;  %v443_v11 = vld [vmem:[#allocation8 + $0x10] sm:$0xff]  ;;  %v1002_v12 = vpack.c.bf16 %v442_v10, %v441_v9  ;;  %v444_v13 = vld [vmem:[#allocation8 + $0x18] sm:$0xff]  ;;  %v874_v15 = vld [vmem:[%s1369_s4] ss:$0 sm:$0xff] }
  0x5d   :  { %997 = vmatpush3.bf16.msra.mxu0 %v994_v3  ;;  %940 = vmatprep.subr.mxu1 %v104_v6  ;;  %v1006_v14 = vpack.c.bf16 %v444_v13, %v443_v11  ;;  %v362_v23 = vld [vmem:[%s1370_s5] sm:$0xff]  ;;  %v363_v24 = vld [vmem:[%s1370_s5 + $0x8] sm:$0xff]  ;;  %v364_v26 = vld [vmem:[%s1370_s5 + $0x10] sm:$0xff] }
  0x5e   :  { %v1010_v25 = vpack.c.bf16 %v363_v24, %v362_v23  ;;  %v365_v27 = vld [vmem:[%s1370_s5 + $0x18] sm:$0xff]  ;;  %v881_v31 = vld [vmem:[%s1372_s7] ss:$0 sm:$0xff]  ;;  %v620_v38 = vld [vmem:[%s1373_s8 + $0x8] sm:$0xff]  ;;  %s1186_s7 = smov [#allocation11]  }
  0x5f   :  { %v1014_v30 = vpack.c.bf16 %v365_v27, %v364_v26  ;;  %v619_v37 = vld [vmem:[%s1373_s8] sm:$0xff]  ;;  %v751_v42 = vld [vmem:[#allocation10 + $0x8] sm:$0xff]  ;;  %s857_s8 = sshll.u32 %s1186_s7, 4  ;;  %s858_s8 = int_to_ptr.vmem [resolvable:$true] %s857_s8 }
  0x60   :  { %933 = vmatmul.mubr.msk.f32.vlgmr.msra.gmra.mrb[0].mxu0 %vm105_vm0, %v103_v4  ;;  %v1018_v39 = vpack.c.bf16 %v620_v38, %v619_v37  ;;  %v750_v41 = vld [vmem:[#allocation10] sm:$0xff]  ;;  %s1149_s25 = scalar_lea.vmem %s858_s8, 16  ;;  %s1153_s27 = scalar_lea.vmem %s858_s8, 32 }
  0x61   :  { %949 = vmatprep.mubr.msk.f32.mxu0 %vm105_vm0, %v102_v2  ;;  %v1022_v43 = vpack.c.bf16 %v751_v42, %v750_v41  ;;  %p1150_p12 = scmp.ne.s32.totalorder %s858_s8, %s1149_s25  ;;  %p1154_p13 = scmp.lt.s32.totalorder %s858_s8, %s858_s8 }
  0x62   :  { %p1155_p0 = scmp.lt.s32.totalorder %s1153_s27, %s1149_s25 }
  0x64   :  { %p1156_p1 = por %p1155_p0, %p1154_p13 }
  0x66   :  { %p1157_p2 = pnand %p1156_p1, %p1150_p12 }
 0x133   :  { %v934_v7 = vpop.f32.mrb[0].mxu0 }
 0x134   :  { %v178_v8 = vpop.f32.mrb[1].mxu0 }
 0x135   :  { %937 = vmatprep.mubr.msk.f32.mxu1 %vm188_vm1, %v178_v8 }
 0x136   :  { %938 = vmatmul.mubr.msk.f32.vlgmr.msra.gmra.mrb[0].mxu1 %vm188_vm1, %v934_v7 }
 0x137   :  { %941 = vmatpush3.msra.mxu1 %v104_v6  ;;  %942 = vmatprep.mubr.msk.f32.mxu1 %vm188_vm1, %v100_v0 }
 0x138   :  { %1003 = vmatprep.subr.bf16.mxu1 %v1002_v12 }
 0x13e   :  { %943 = vmatmul.mubr.msk.f32.vlgmr.msra.gmra.mrb[0].mxu1 %vm188_vm1, %v101_v1 }
 0x13f   :  { %1005 = vmatpush3.bf16.msra.mxu1 %v1002_v12 }
 0x140   :  { %1007 = vmatprep.subr.bf16.mxu1 %v1006_v14 }
 0x143   :  { %1009 = vmatpush3.bf16.msra.mxu1 %v1006_v14 }
 0x144   :  { %1011 = vmatprep.subr.bf16.mxu1 %v1010_v25 }
 0x211   :  { %v944_v16 = vpop.f32.mrb[0].mxu1 }
 0x212   :  { %v359_v17 = vadd.f32 %v944_v16, %v874_v15  ;;  %v342_v18 = vpop.f32.mrb[1].mxu1 }
 0x213   :  { %v358_v19 = vadd.f32 %v874_v15, %v342_v18 }
 0x214   :  { %v361_v20 = vmax.f32 %v359_v17, 0.0 }
 0x215   :  { %v360_v21 = vmax.f32 %v358_v19, 0.0 }
 0x217   :  { %v998_v22 = vpack.c.bf16 %v361_v20, %v360_v21 }
 0x219   :  { %999 = vmatprep.subr.bf16.mxu0 %v998_v22 }
 0x21a   :  { %1001 = vmatpush3.bf16.msra.mxu0 %v998_v22 }
 0x21b   :  { %1019 = vmatprep.subr.bf16.mxu0 %v1018_v39 }
 0x21d   :  { %950 = vmatmul.mubr.msk.f32.vlgmr.msra.gmra.mrb[2].mxu0 %vm105_vm0, %v103_v4 }
 0x21e   :  { %1021 = vmatpush3.bf16.msra.mxu0 %v1018_v39 }
 0x21f   :  { %1023 = vmatprep.subr.bf16.mxu0 %v1022_v43 }
 0x2f0   :  { %v951_v28 = vpop.f32.mrb[2].mxu0 }
 0x2f1   :  { %v432_v29 = vpop.f32.mrb[3].mxu0 }
 0x2f2   :  { %960 = vmatprep.mubr.msk.f32.mxu1 %vm445_vm2, %v432_v29 }
 0x2f3   :  { %961 = vmatmul.mubr.msk.f32.vlgmr.msra.gmra.mrb[2].mxu1 %vm445_vm2, %v951_v28 }
 0x2f4   :  { %1013 = vmatpush3.bf16.msra.mxu1 %v1010_v25  ;;  %971 = vmatprep.mubr.msk.f32.mxu1 %vm445_vm2, %v360_v21 }
 0x2f5   :  { %1015 = vmatprep.subr.bf16.mxu1 %v1014_v30 }
 0x2f8   :  { %1017 = vmatpush3.bf16.msra.mxu1 %v1014_v30 }
 0x2fb   :  { %972 = vmatmul.mubr.msk.f32.vlgmr.msra.gmra.mrb[2].mxu1 %vm445_vm2, %v361_v20 }
 0x3ce   :  { %v973_v32 = vpop.f32.mrb[2].mxu1 }
 0x3cf   :  { %v599_v33 = vpop.f32.mrb[3].mxu1  ;;  %v616_v35 = vadd.f32 %v973_v32, %v881_v31 }
 0x3d0   :  { %v615_v34 = vadd.f32 %v881_v31, %v599_v33 }
 0x3d1   :  { %v618_v40 = vmax.f32 %v616_v35, 0.0 }
 0x3d2   :  { %v617_v36 = vmax.f32 %v615_v34, 0.0 }
 0x3d4   :  { %621 = vxpose.xlu0.b32.start [1/2] (short) (narrow) %v617_v36, 32 }
 0x3d8   :  { %622 = vxpose.xlu0.b32.end [2/2] (short) (narrow) %v618_v40, 32 }
 0x454   :  { %v637_v44 = vpop.trf.xlu0 }
 0x455   :  { %978 = vmatprep.mubr.msk.f32.mxu0 %vm105_vm0, %v637_v44 }
 0x458   :  { %v638_v45 = vpop.trf.xlu0 }
 0x459   :  { %979 = vmatmul.mubr.msk.f32.vlgmr.msra.gmra.mrb[4].mxu0 %vm105_vm0, %v638_v45 }
 0x45a   :  { %1025 = vmatpush3.bf16.msra.mxu0 %v1022_v43 }
 0x45c   :  { %v639_v46 = vpop.trf.xlu0 }
 0x45d   :  { %981 = vmatprep.mubr.msk.f32.mxu0 %vm105_vm0, %v639_v46 }
 0x460   :  { %v640_v47 = vpop.trf.xlu0 }
 0x461   :  { %982 = vmatmul.mubr.msk.f32.gmra.mrb[6].mxu0 %vm105_vm0, %v640_v47 }
 0x462   :  { %988 = vmatprep.mubr.msk.f32.mxu0 %vm105_vm0, %v637_v44 }
 0x465   :  { %989 = vmatmul.mubr.msk.f32.vlgmr.msra.gmra.mrb[8].mxu0 %vm105_vm0, %v638_v45 }
 0x466   :  { %991 = vmatprep.mubr.msk.f32.mxu0 %vm105_vm0, %v639_v46 }
 0x469   :  { %992 = vmatmul.mubr.msk.f32.gmra.mrb[10].mxu0 %vm105_vm0, %v640_v47 }
 0x52c   :  { %v980_v48 = vpop.f32.mrb[4].mxu0 }
 0x52d   :  { %v731_v49 = vpop.f32.mrb[5].mxu0 }
 0x534   :  { %v983_v50 = vpop.f32.mrb[6].mxu0 }
 0x535   :  { %v741_v51 = vpop.f32.mrb[7].mxu0 }
 0x538   :  { %v990_v52 = vpop.f32.mrb[8].mxu0 }
 0x539   :  { %v838_v53 = vmul.f32 %v990_v52, %v980_v48  ;;  %v818_v54 = vpop.f32.mrb[9].mxu0 }
 0x53a   :  { %v837_v55 = vmul.f32 %v818_v54, %v731_v49 }
 0x53c   :  { %v841_v56 = vadd.f32 %v838_v53, %v837_v55  ;;  %v993_v57 = vpop.f32.mrb[10].mxu0 }
 0x53d   :  { %v840_v58 = vmul.f32 %v993_v57, %v983_v50  ;;  %v828_v59 = vpop.f32.mrb[11].mxu0 }
 0x53e   :  { %v839_v60 = vmul.f32 %v828_v59, %v741_v51 }
 0x540   :  { %v842_v61 = vadd.f32 %v841_v56, %v839_v60 }
 0x542   :  { %v843_v62 = vadd.f32 %v842_v61, %v840_v58 }
 0x544   :  { %v844_v63 = vrot.slane %v843_v62, 4 }
 0x546   :  { %v845_v0 = vadd.f32 %v844_v63, %v843_v62 }
 0x548   :  { %v846_v1 = vrot.slane %v845_v0, 2 }
 0x54a   :  { %v847_v2 = vadd.f32 %v846_v1, %v845_v0 }
 0x54c   :  { %v848_v3 = vrot.slane %v847_v2, 1 }
 0x54e   :  { %v849_v4 = vadd.f32 %v848_v3, %v847_v2 }
 0x550   :  { %850 = vst [vmem:[#allocation11] sm:$0x1] %v849_v4 }
 0x551   :  { %1160 = shalt.err (!%p1157_p2)
}
 0x552   :  { %s1161_s26 = scalar_lea.hbm %s1375_s10, 16 }
 0x553   :  { %p1162_p3 = scmp.ne.s32.totalorder %s1375_s10, %s1161_s26  ;;  %p1165_p4 = scmp.lt.u32.totalorder %s1161_s26, %s1375_s10 }
 0x555   :  { %p1167_p5 = pnand %p1165_p4, %p1162_p3 }
 0x557   :  { %1170 = shalt.err (!%p1167_p5)
}
 0x558   :  { %860 = dma.vmem_to_hbm [thread:$0]  %s858_s8, 16, %s1375_s10, [#allocation4]  }
 0x559   :  { %1177 = dma.done.wait [#allocation4], 16  }
 0x55a   :  { %1178 = vsyncadd [#allocation4], 4294967280 }
 0x55b   :  { %864 = vsyncpa [#allocation3], 1 }
 0x55c   :  { %865 = vsyncpa [#allocation6], 1 }
 0x55d   :  { %866 = vsyncpa [#allocation9], 1 }
 0x55e   :  { %867 = vsyncpa [#allocation4], 1 }

</bundles_post_ra>
